<compile_context>
chip_gen: v7x
topology: tpu7x:2x2x1
jax: 0.10.0
libtpu: 0.0.40
codegen_flags: <defaults>
</compile_context>

<pallas_src>
import jax
import jax.numpy as jnp
from jax.experimental import pallas as pl
from jax.experimental.pallas import tpu as pltpu

_ODD_BLOCK_COLS = 128 * 1024  # block width (elements) for the (1, n) odd-size path


def _binary_activation_kernel(x_ref, o_ref):
    x = x_ref[...]
    one = jnp.ones_like(x)
    # >= 0 -> +1 ; < 0 -> -1 ; neither (NaN) -> unchanged. Matches PyTorch's
    # two-mask in-place update (NaN fails both masks; -0.0 >= 0 -> +1).
    o_ref[...] = jnp.where(x >= 0, one, jnp.where(x < 0, -one, x))


def _stream_config():
    """Return (target_block_bytes, vmem_limit_bytes) tuned per TPU generation."""
    target_block_bytes = 4 << 20   # 4 MiB blocks: ~HBM roofline on v5e / v6e
    vmem_limit = 32 << 20
    try:
        info = pltpu.get_tpu_info()
        vmem_cap = getattr(info, "vmem_capacity_bytes", None)
        if vmem_cap is not None and vmem_cap <= (64 << 20):
            # v7x (64 MiB VMEM, ~3.2 TB/s per TC): larger blocks amortize the
            # fixed per-grid-step overhead; 2*(in+out) = 32 MiB in flight.
            target_block_bytes = 8 << 20
            vmem_limit = 48 << 20
    except Exception:
        pass  # unknown platform / query failure -> safe defaults above
    return target_block_bytes, vmem_limit


def _pick_lane(n):
    for lane in (1024, 512, 256, 128):
        if n % lane == 0:
            return lane
    return None


def _round_up(v, m):
    return (v + m - 1) // m * m


def _run(x2d, block_shape, grid, index_map, vmem_limit, donate):
    n = x2d.size
    itemsize = jnp.dtype(x2d.dtype).itemsize
    alias = {0: 0} if donate else {}
    return pl.pallas_call(
        _binary_activation_kernel,
        out_shape=jax.ShapeDtypeStruct(x2d.shape, x2d.dtype),
        grid_spec=pltpu.PrefetchScalarGridSpec(
            num_scalar_prefetch=0,
            grid=grid,
            in_specs=[pl.BlockSpec(block_shape, index_map)],
            out_specs=pl.BlockSpec(block_shape, index_map),
        ),
        compiler_params=pltpu.CompilerParams(
            dimension_semantics=("parallel",),
            vmem_limit_bytes=vmem_limit,
        ),
        cost_estimate=pl.CostEstimate(
            flops=2 * n, transcendentals=0, bytes_accessed=2 * n * itemsize),
        input_output_aliases=alias,
    )(x2d)


def binary_activation(x: jax.Array, *, donate_input: bool = False) -> jax.Array:
    """Binarize x: >=0 -> +1, <0 -> -1, NaN unchanged (PyTorch BinaryActivation).

    donate_input=True only helps when the caller no longer needs `x` (e.g. an
    intermediate activation whose buffer can be reused); for live inputs the
    default (False) avoids a hidden defensive copy by XLA.
    """
    orig_shape = x.shape
    n = x.size
    if n == 0:
        return x  # nothing to do; avoids an empty grid

    itemsize = jnp.dtype(x.dtype).itemsize
    target_block_bytes, vmem_limit = _stream_config()

    x_flat = jnp.reshape(x, (n,))  # free for contiguous data
    lane = _pick_lane(n)

    if lane is not None:
        # Fast path: lane-dense (rows, lane) slab -> 1 HBM read + 1 HBM write.
        rows = n // lane
        x2d = jnp.reshape(x_flat, (rows, lane))
        align = max(8, 32 // itemsize)  # sublane multiple for this dtype
        cap_rows = max(align,
                       (target_block_bytes // (lane * itemsize)) // align * align)
        if rows <= cap_rows:
            # Split non-trivial inputs into >=2 blocks so the "parallel" grid
            # axis can be sharded across both TensorCores on v7x. Costs one
            # cheap extra grid step on single-TC chips.
            if rows > align:
                block_rows = min(rows, _round_up(pl.cdiv(rows, 2), align))
            else:
                block_rows = rows
        else:
            block_rows = cap_rows
        grid = (pl.cdiv(rows, block_rows),)
        out2d = _run(x2d, (block_rows, lane), grid, lambda i: (i, 0),
                     vmem_limit, donate_input)
    else:
        # Odd-size path (not a multiple of 128): run directly on a (1, n) view
        # with a ragged lane grid -- no pad/unpad extra HBM passes. Block width
        # is capped so the sublane-padded VMEM buffers stay small (<= ~4 MiB).
        x2d = jnp.reshape(x_flat, (1, n))
        block_cols = n if n <= _ODD_BLOCK_COLS else _ODD_BLOCK_COLS
        grid = (pl.cdiv(n, block_cols),)
        out2d = _run(x2d, (1, block_cols), grid, lambda i: (0, i),
                     vmem_limit, donate_input)

    return jnp.reshape(out2d, orig_shape)


if __name__ == "__main__":
    def _ref(x):
        one = jnp.ones_like(x)
        return jnp.where(x >= 0, one, jnp.where(x < 0, -one, x))

    def _check(y, ref):
        assert y.shape == ref.shape and y.dtype == ref.dtype
        same = (y == ref) | (jnp.isnan(y) & jnp.isnan(ref))
        assert bool(jnp.all(same))

    key = jax.random.PRNGKey(0)
    k1, k2, k3, k4 = jax.random.split(key, 4)

    # 1) Conv-style NCHW activation (fast path, single lane-dense block).
    x1 = jax.random.normal(k1, (2, 4, 16, 16), dtype=jnp.float32)
    r1 = _ref(x1)
    y1 = jax.block_until_ready(binary_activation(x1))
    _check(y1, r1)

    # 1b) Same input through the donated / in-place-style path.
    y1b = jax.block_until_ready(binary_activation(x1, donate_input=True))
    _check(y1b, r1)

    # 2) Multi-block fast path with a ragged last row-block (rows=150, block=80).
    x2 = jax.random.normal(k2, (4, 300, 128), dtype=jnp.float32)
    r2 = _ref(x2)
    y2 = jax.block_until_ready(binary_activation(x2))
    _check(y2, r2)

    # 3) Odd-sized input (single (1, n) block) with NaN / -0.0 / +0.0.
    x3 = jax.random.normal(k3, (3, 5, 7), dtype=jnp.float32)
    x3 = x3.at[0, 0, 0].set(jnp.nan)
    x3 = x3.at[0, 0, 1].set(-0.0)
    x3 = x3.at[0, 0, 2].set(0.0)
    r3 = _ref(x3)
    y3 = jax.block_until_ready(binary_activation(x3))
    _check(y3, r3)
    assert float(y3[0, 0, 1]) == 1.0 and float(y3[0, 0, 2]) == 1.0  # -0.0/+0.0 -> +1
    assert bool(jnp.isnan(y3[0, 0, 0]))                             # NaN passes through

    # 4) Odd-sized input large enough for the ragged multi-block (1, n) path.
    x4 = jax.random.normal(k4, (2 * _ODD_BLOCK_COLS + 5,), dtype=jnp.float32)
    r4 = _ref(x4)
    y4 = jax.block_until_ready(binary_activation(x4))
    _check(y4, r4)

    print("KERNEL_OK")
</pallas_src>

<mosaic_0001>
module attributes {stable_mosaic.version = 11 : i64} {
  func.func @_binary_activation_kernel(%arg0: i32, %arg1: memref<2x1024xf32, #tpu.memory_space<vmem>>, %arg2: memref<2x1024xf32, #tpu.memory_space<vmem>>) attributes {dimension_semantics = [#tpu.dimension_semantics<parallel>], iteration_bounds = array<i64: 1>, scalar_prefetch = 0 : i64, scratch_operands = 0 : i64, tpu.core_type = #tpu.core_type<tc>, window_params = [{transform_indices = @transform_0, window_bounds = array<i64: 2, 1024>}, {transform_indices = @transform_1, window_bounds = array<i64: 2, 1024>}]} {
    %c0 = arith.constant 0 : index
    %c0_0 = arith.constant 0 : index
    %0 = vector.load %arg1[%c0, %c0_0] : memref<2x1024xf32, #tpu.memory_space<vmem>>, vector<2x1024xf32>
    %cst = arith.constant 1.000000e+00 : f32
    %1 = vector.broadcast %cst : f32 to vector<2x1024xf32>
    %cst_1 = arith.constant 0.000000e+00 : f32
    %2 = vector.broadcast %cst_1 : f32 to vector<2x1024xf32>
    %3 = arith.cmpf oge, %0, %2 : vector<2x1024xf32>
    %cst_2 = arith.constant 0.000000e+00 : f32
    %4 = vector.broadcast %cst_2 : f32 to vector<2x1024xf32>
    %5 = arith.cmpf olt, %0, %4 : vector<2x1024xf32>
    %cst_3 = arith.constant 0.000000e+00 : f32
    %6 = vector.broadcast %cst_3 : f32 to vector<2x1024xf32>
    %7 = arith.subf %6, %1 : vector<2x1024xf32>
    %8 = arith.select %5, %7, %0 : vector<2x1024xi1>, vector<2x1024xf32>
    %9 = arith.select %3, %1, %8 : vector<2x1024xi1>, vector<2x1024xf32>
    %c0_4 = arith.constant 0 : index
    %c0_5 = arith.constant 0 : index
    %10 = vector.load %arg2[%c0_4, %c0_5] : memref<2x1024xf32, #tpu.memory_space<vmem>>, vector<2x1024xf32>
    tpu.vector_store %arg2[%c0_4, %c0_5], %9 {strides = array<i32>} : memref<2x1024xf32, #tpu.memory_space<vmem>>, vector<2x1024xf32>,
    return
  }
  func.func @transform_0(%arg0: i32) -> (i32, i32) {
    %c0_i32 = arith.constant 0 : i32
    %c0_i32_0 = arith.constant 0 : i32
    return %arg0, %c0_i32 : i32, i32
  }
  func.func @transform_1(%arg0: i32) -> (i32, i32) {
    %c0_i32 = arith.constant 0 : i32
    %c0_i32_0 = arith.constant 0 : i32
    return %arg0, %c0_i32 : i32, i32
  }
}

</mosaic_0001>

<bundles_post_ra>
// kernel: tpu_custom_call.1
= control target key start
LH: loop header
LB: loop body
LE: loop exit
PB: predicated region body
PF: predicated region fallthrough
CT: control target
= control target key end

     0   :  { %6 = vsyncpa [#allocation3], 0  ;;  %s134_s0 = inlined_call_operand.hbm [shape: f32[2,1024], index: 0, kind: input, shape index: {}]   ;;  %s135_s1 = inlined_call_operand.hbm [shape: f32[2,1024], index: 1, kind: output, shape index: {}]  }
   0x1   :  { %7 = vsyncpa [#allocation4], 0  ;;  %s98_s6 = smov [#allocation2]   ;;  %s50_s10 = scalar_lea.hbm %s134_s0, 256 }
   0x2   :  { %s14_s7 = sshll.u32 %s98_s6, 4  ;;  %p51_p0 = scmp.ne.s32.totalorder %s134_s0, %s50_s10  ;;  %s15_s7 = int_to_ptr.vmem [resolvable:$true] %s14_s7 }
   0x3   :  { %p54_p1 = scmp.lt.u32.totalorder %s50_s10, %s134_s0 }
   0x5   :  { %p56_p2 = pnand %p54_p1, %p51_p0 }
   0x7   :  { %59 = shalt.err (!%p56_p2)
}
   0x8   :  { %s60_s15 = scalar_lea.vmem %s15_s7, 256  ;;  %p65_p4 = scmp.lt.s32.totalorder %s15_s7, %s15_s7 }
   0x9   :  { %p61_p3 = scmp.ne.s32.totalorder %s15_s7, %s60_s15  ;;  %p66_p5 = scmp.lt.s32.totalorder %s60_s15, %s60_s15 }
   0xb   :  { %p67_p6 = por %p66_p5, %p65_p4 }
   0xd   :  { %p68_p7 = pnand %p67_p6, %p61_p3 }
   0xf   :  { %71 = shalt.err (!%p68_p7)
}
  0x10   :  { %17 = dma.hbm_to_vmem [thread:$0]  %s134_s0, 256, %s15_s7, [#allocation3]  }
  0x11   :  { %94 = dma.done.wait [#allocation3], 256  }
  0x12   :  { %95 = vsyncadd [#allocation3], 4294967040  ;;  %s99_s18 = smov [#allocation5]   ;;  %v21_v0 = vld [vmem:[#allocation2] sm:$0xff]  ;;  %v22_v1 = vld [vmem:[#allocation2 + $0x8] sm:$0xff] }
  0x13   :  { %s39_s19 = sshll.u32 %s99_s18, 4  ;;  %vm23_vm0 = vcmp.ge.f32.partialorder %v21_v0, 0.0  ;;  %vm25_vm1 = vcmp.lt.f32.partialorder %v21_v0, 0.0  ;;  %vm24_vm2 = vcmp.ge.f32.partialorder %v22_v1, 0.0  ;;  %vm26_vm3 = vcmp.lt.f32.partialorder %v22_v1, 0.0  ;;  %s40_s19 = int_to_ptr.vmem [resolvable:$true] %s39_s19 }
  0x14   :  { %v27_v2 = vsel %vm25_vm1, -1.0, %v21_v0  ;;  %v28_v3 = vsel %vm26_vm3, -1.0, %v22_v1  ;;  %s72_s20 = scalar_lea.vmem %s40_s19, 256  ;;  %p77_p9 = scmp.lt.s32.totalorder %s40_s19, %s40_s19 }
  0x15   :  { %v29_v4 = vsel %vm23_vm0, 1.0, %v27_v2  ;;  %v30_v5 = vsel %vm24_vm2, 1.0, %v28_v3  ;;  %p73_p8 = scmp.ne.s32.totalorder %s40_s19, %s72_s20  ;;  %p78_p10 = scmp.lt.s32.totalorder %s72_s20, %s72_s20 }
  0x16   :  { %31 = vst [vmem:[#allocation5] sm:$0xff] %v29_v4  ;;  %32 = vst [vmem:[#allocation5 + $0x8] sm:$0xff] %v30_v5 }
  0x17   :  { %p79_p11 = por %p78_p10, %p77_p9 }
  0x19   :  { %p80_p12 = pnand %p79_p11, %p73_p8 }
  0x1b   :  { %83 = shalt.err (!%p80_p12)
}
  0x1c   :  { %s84_s22 = scalar_lea.hbm %s135_s1, 256 }
  0x1d   :  { %p85_p13 = scmp.ne.s32.totalorder %s135_s1, %s84_s22  ;;  %p88_p0 = scmp.lt.u32.totalorder %s84_s22, %s135_s1 }
  0x1f   :  { %p90_p1 = pnand %p88_p0, %p85_p13 }
  0x21   :  { %93 = shalt.err (!%p90_p1)
}
  0x22   :  { %42 = dma.vmem_to_hbm [thread:$0]  %s40_s19, 256, %s135_s1, [#allocation4]  }
  0x23   :  { %96 = dma.done.wait [#allocation4], 256  }
  0x24   :  { %97 = vsyncadd [#allocation4], 4294967040 }
  0x25   :  { %46 = vsyncpa [#allocation3], 1 }
  0x26   :  { %47 = vsyncpa [#allocation4], 1 }

</bundles_post_ra>
